<compile_context>
chip_gen: v6e
topology: v6e:2x2x1
jax: 0.10.0
libtpu: 0.0.40
codegen_flags: <defaults>
</compile_context>

<pallas_src>
import functools
import math

import jax
import jax.numpy as jnp
from jax.experimental import pallas as pl
from jax.experimental.pallas import tpu as pltpu


def _round_up(x, m):
    return (x + m - 1) // m * m


# ---------------------------------------------------------------------------
# Kernel 1: node projection + per-node attention logits (computed once).
#   h  = x @ W          (tm, F)
#   f1 = h @ a_left     (tm, 1)   source contribution to the edge score
#   f2 = h @ a_right    (tm, 1)   target contribution to the edge score
# ---------------------------------------------------------------------------
def _project_kernel(x_ref, w_ref, al_ref, ar_ref, h_ref, f1_ref, f2_ref):
    h = jnp.dot(x_ref[...], w_ref[...], preferred_element_type=jnp.float32)
    h_ref[...] = h.astype(h_ref.dtype)
    f1_ref[...] = jnp.dot(h, al_ref[...], preferred_element_type=jnp.float32)
    f2_ref[...] = jnp.dot(h, ar_ref[...], preferred_element_type=jnp.float32)


# ---------------------------------------------------------------------------
# Kernel 2: masked attention + aggregation, accumulated over column tiles.
#   S[i,j] = f1[i] + f2[j]
#   E[i,j] = exp(-leakyrelu_alpha(S[i,j]))        masked to real edges
#   out_i  = elu( (sum_j E[i,j] h_j) / sum_j E[i,j] )     (elu iff concat)
# ---------------------------------------------------------------------------
def _attention_kernel(f1_ref, f2_ref, adj_ref, h_ref, o_ref,
                      acc_ref, rsum_ref, *, alpha, concat):
    j = pl.program_id(1)

    @pl.when(j == 0)
    def _init():
        acc_ref[...] = jnp.zeros_like(acc_ref)
        rsum_ref[...] = jnp.zeros_like(rsum_ref)

    s = f1_ref[...] + f2_ref[...]                    # (tm,1)+(1,tn) -> (tm,tn)
    s = jnp.where(s > 0, s, alpha * s)               # LeakyReLU(negative_slope=alpha)
    e = jnp.exp(-s)
    e = jnp.where(adj_ref[...] != 0, e, 0.0)         # keep only real edges
    # TODO(synk): training-mode dropout on edge weights omitted (eval mode = identity).

    rsum_ref[...] += jnp.sum(e, axis=1, keepdims=True)
    acc_ref[...] += jnp.dot(e, h_ref[...], preferred_element_type=jnp.float32)

    @pl.when(j == pl.num_programs(1) - 1)
    def _finalize():
        hp = acc_ref[...] / rsum_ref[...]
        if concat:                                   # F.elu, alpha = 1.0
            hp = jnp.where(hp > 0, hp, jnp.expm1(jnp.minimum(hp, 0.0)))
        o_ref[...] = hp.astype(o_ref.dtype)


def sp_graph_attention_layer(x, adj, W, a, *, alpha, concat=True, tile=128):
    """Forward pass of SpGraphAttentionLayer (eval mode).

    x: (N, in_features) f32, adj: (N, N) f32 (nonzero = edge),
    W: (in_features, out_features) f32, a: (1, 2*out_features) f32.
    Returns (N, out_features) f32.
    """
    n, d_in = x.shape
    f_out = W.shape[1]
    assert adj.shape == (n, n)
    assert a.shape == (1, 2 * f_out)
    assert tile % 128 == 0

    a_l = a[:, :f_out].reshape(f_out, 1).astype(jnp.float32)
    a_r = a[:, f_out:].reshape(f_out, 1).astype(jnp.float32)

    # Pad N to a lane-friendly multiple of the tile size. Padded adjacency
    # columns are zero, so they are masked out; padded rows are sliced off.
    n_pad = _round_up(n, tile)
    tm = tn = tile

    xf = x.astype(jnp.float32)
    adjf = adj.astype(jnp.float32)
    if n_pad != n:
        xf = jnp.pad(xf, ((0, n_pad - n), (0, 0)))
        adjf = jnp.pad(adjf, ((0, n_pad - n), (0, n_pad - n)))

    # --- Kernel 1: projection + logits (computed once, reused by kernel 2) ---
    h, f1, f2 = pl.pallas_call(
        _project_kernel,
        out_shape=(
            jax.ShapeDtypeStruct((n_pad, f_out), jnp.float32),
            jax.ShapeDtypeStruct((n_pad, 1), jnp.float32),
            jax.ShapeDtypeStruct((n_pad, 1), jnp.float32),
        ),
        grid_spec=pltpu.PrefetchScalarGridSpec(
            num_scalar_prefetch=0,
            grid=(n_pad // tm,),
            in_specs=[
                pl.BlockSpec((tm, d_in), lambda i: (i, 0)),    # x row tile
                pl.BlockSpec((d_in, f_out), lambda i: (0, 0)),  # W resident
                pl.BlockSpec((f_out, 1), lambda i: (0, 0)),     # a_left
                pl.BlockSpec((f_out, 1), lambda i: (0, 0)),     # a_right
            ],
            out_specs=(
                pl.BlockSpec((tm, f_out), lambda i: (i, 0)),
                pl.BlockSpec((tm, 1), lambda i: (i, 0)),
                pl.BlockSpec((tm, 1), lambda i: (i, 0)),
            ),
        ),
        compiler_params=pltpu.CompilerParams(
            dimension_semantics=("parallel",)),
    )(xf, W.astype(jnp.float32), a_l, a_r)

    f2_row = f2.reshape(1, n_pad)   # contiguous reshape, no transpose needed

    # --- Kernel 2: tiled masked attention + aggregation ---------------------
    out_pad = pl.pallas_call(
        functools.partial(_attention_kernel,
                          alpha=float(alpha), concat=bool(concat)),
        out_shape=jax.ShapeDtypeStruct((n_pad, f_out), jnp.float32),
        grid_spec=pltpu.PrefetchScalarGridSpec(
            num_scalar_prefetch=0,
            grid=(n_pad // tm, n_pad // tn),
            in_specs=[
                pl.BlockSpec((tm, 1), lambda i, j: (i, 0)),      # f1 rows
                pl.BlockSpec((1, tn), lambda i, j: (0, j)),      # f2 cols
                pl.BlockSpec((tm, tn), lambda i, j: (i, j)),     # adjacency tile
                pl.BlockSpec((tn, f_out), lambda i, j: (j, 0)),  # h rows to aggregate
            ],
            out_specs=pl.BlockSpec((tm, f_out), lambda i, j: (i, 0)),
            scratch_shapes=[
                pltpu.VMEM((tm, f_out), jnp.float32),   # weighted-sum accumulator
                pltpu.VMEM((tm, 1), jnp.float32),       # rowsum accumulator
            ],
        ),
        compiler_params=pltpu.CompilerParams(
            dimension_semantics=("parallel", "arbitrary")),
    )(f1, f2_row, adjf, h)

    return out_pad[:n]


if __name__ == "__main__":
    N, D_IN, D_OUT = 256, 32, 16
    ALPHA = 0.2
    CONCAT = True

    key = jax.random.PRNGKey(0)
    kx, ka, kw, katt = jax.random.split(key, 4)

    x = jax.random.normal(kx, (N, D_IN), dtype=jnp.float32)

    # Sparse-ish 0/1 adjacency with self-loops (every node has >= 1 edge,
    # so e_rowsum is never zero, matching the usual GAT setup).
    adj = (jax.random.uniform(ka, (N, N)) < 0.05).astype(jnp.float32)
    adj = jnp.maximum(adj, jnp.eye(N, dtype=jnp.float32))

    # xavier_normal_(gain=1.414) equivalents.
    std_w = 1.414 * math.sqrt(2.0 / (D_IN + D_OUT))
    W = std_w * jax.random.normal(kw, (D_IN, D_OUT), dtype=jnp.float32)
    std_a = 1.414 * math.sqrt(2.0 / (1 + 2 * D_OUT))
    a = std_a * jax.random.normal(katt, (1, 2 * D_OUT), dtype=jnp.float32)

    out = sp_graph_attention_layer(x, adj, W, a, alpha=ALPHA, concat=CONCAT)
    out = jax.block_until_ready(out)

    # Pure-JAX dense reference of the sparse GAT forward (eval mode).
    h_ref = x @ W
    f1_ref = h_ref @ a[:, :D_OUT].T            # (N, 1)
    f2_ref = h_ref @ a[:, D_OUT:].T            # (N, 1)
    s_ref = f1_ref + f2_ref.T                  # (N, N)
    s_ref = jnp.where(s_ref > 0, s_ref, ALPHA * s_ref)
    e_ref = jnp.where(adj != 0, jnp.exp(-s_ref), 0.0)
    rowsum = e_ref.sum(axis=1, keepdims=True)
    hp = (e_ref @ h_ref) / rowsum
    ref = jnp.where(hp > 0, hp, jnp.expm1(jnp.minimum(hp, 0.0))) if CONCAT else hp

    assert out.shape == (N, D_OUT)
    assert jnp.allclose(out, ref, atol=1e-4, rtol=1e-4), "mismatch vs reference"
    print("KERNEL_OK")
</pallas_src>

<mosaic_0001>
module attributes {stable_mosaic.version = 11 : i64} {
  func.func @_project_kernel(%arg0: i32, %arg1: memref<128x32xf32, #tpu.memory_space<vmem>>, %arg2: memref<32x16xf32, #tpu.memory_space<vmem>>, %arg3: memref<16x1xf32, #tpu.memory_space<vmem>>, %arg4: memref<16x1xf32, #tpu.memory_space<vmem>>, %arg5: memref<128x16xf32, #tpu.memory_space<vmem>>, %arg6: memref<128x1xf32, #tpu.memory_space<vmem>>, %arg7: memref<128x1xf32, #tpu.memory_space<vmem>>) attributes {dimension_semantics = [#tpu.dimension_semantics<parallel>], iteration_bounds = array<i64: 2>, scalar_prefetch = 0 : i64, scratch_operands = 0 : i64, tpu.core_type = #tpu.core_type<tc>, window_params = [{transform_indices = @transform_0, window_bounds = array<i64: 128, 32>}, {pipeline_mode = #tpu.pipeline_mode<synchronous>, transform_indices = @transform_1, window_bounds = array<i64: 32, 16>}, {pipeline_mode = #tpu.pipeline_mode<synchronous>, transform_indices = @transform_2, window_bounds = array<i64: 16, 1>}, {pipeline_mode = #tpu.pipeline_mode<synchronous>, transform_indices = @transform_3, window_bounds = array<i64: 16, 1>}, {transform_indices = @transform_4, window_bounds = array<i64: 128, 16>}, {transform_indices = @transform_5, window_bounds = array<i64: 128, 1>}, {transform_indices = @transform_6, window_bounds = array<i64: 128, 1>}]} {
    %c0 = arith.constant 0 : index
    %c0_0 = arith.constant 0 : index
    %0 = vector.load %arg1[%c0, %c0_0] : memref<128x32xf32, #tpu.memory_space<vmem>>, vector<128x32xf32>
    %c0_1 = arith.constant 0 : index
    %c0_2 = arith.constant 0 : index
    %1 = vector.load %arg2[%c0_1, %c0_2] : memref<32x16xf32, #tpu.memory_space<vmem>>, vector<32x16xf32>
    %cst = arith.constant dense<0.000000e+00> : vector<128x16xf32>
    %2 = tpu.matmul %0, %1, %cst {dimension_numbers = #tpu.dot_dimension_numbers<[1], [0], [0], [1], [0, 0, 1, 1], [], []>} : vector<128x32xf32>, vector<32x16xf32>, vector<128x16xf32> -> vector<128x16xf32>
    %c0_3 = arith.constant 0 : index
    %c0_4 = arith.constant 0 : index
    %3 = vector.load %arg5[%c0_3, %c0_4] : memref<128x16xf32, #tpu.memory_space<vmem>>, vector<128x16xf32>
    tpu.vector_store %arg5[%c0_3, %c0_4], %2 {strides = array<i32>} : memref<128x16xf32, #tpu.memory_space<vmem>>, vector<128x16xf32>,
    %c0_5 = arith.constant 0 : index
    %c0_6 = arith.constant 0 : index
    %4 = vector.load %arg3[%c0_5, %c0_6] : memref<16x1xf32, #tpu.memory_space<vmem>>, vector<16x1xf32>
    %cst_7 = arith.constant dense<0.000000e+00> : vector<128x1xf32>
    %5 = tpu.matmul %2, %4, %cst_7 {dimension_numbers = #tpu.dot_dimension_numbers<[1], [0], [0], [1], [0, 0, 1, 1], [], []>} : vector<128x16xf32>, vector<16x1xf32>, vector<128x1xf32> -> vector<128x1xf32>
    %c0_8 = arith.constant 0 : index
    %c0_9 = arith.constant 0 : index
    %6 = vector.load %arg6[%c0_8, %c0_9] : memref<128x1xf32, #tpu.memory_space<vmem>>, vector<128x1xf32>
    tpu.vector_store %arg6[%c0_8, %c0_9], %5 {strides = array<i32>} : memref<128x1xf32, #tpu.memory_space<vmem>>, vector<128x1xf32>,
    %c0_10 = arith.constant 0 : index
    %c0_11 = arith.constant 0 : index
    %7 = vector.load %arg4[%c0_10, %c0_11] : memref<16x1xf32, #tpu.memory_space<vmem>>, vector<16x1xf32>
    %cst_12 = arith.constant dense<0.000000e+00> : vector<128x1xf32>
    %8 = tpu.matmul %2, %7, %cst_12 {dimension_numbers = #tpu.dot_dimension_numbers<[1], [0], [0], [1], [0, 0, 1, 1], [], []>} : vector<128x16xf32>, vector<16x1xf32>, vector<128x1xf32> -> vector<128x1xf32>
    %c0_13 = arith.constant 0 : index
    %c0_14 = arith.constant 0 : index
    %9 = vector.load %arg7[%c0_13, %c0_14] : memref<128x1xf32, #tpu.memory_space<vmem>>, vector<128x1xf32>
    tpu.vector_store %arg7[%c0_13, %c0_14], %8 {strides = array<i32>} : memref<128x1xf32, #tpu.memory_space<vmem>>, vector<128x1xf32>,
    return
  }
  func.func @transform_0(%arg0: i32) -> (i32, i32) {
    %c0_i32 = arith.constant 0 : i32
    %c0_i32_0 = arith.constant 0 : i32
    return %arg0, %c0_i32 : i32, i32
  }
  func.func @transform_1(%arg0: i32) -> (i32, i32) {
    %c0_i32 = arith.constant 0 : i32
    %c0_i32_0 = arith.constant 0 : i32
    %c0_i32_1 = arith.constant 0 : i32
    return %c0_i32, %c0_i32_0 : i32, i32
  }
  func.func @transform_2(%arg0: i32) -> (i32, i32) {
    %c0_i32 = arith.constant 0 : i32
    %c0_i32_0 = arith.constant 0 : i32
    %c0_i32_1 = arith.constant 0 : i32
    return %c0_i32, %c0_i32_0 : i32, i32
  }
  func.func @transform_3(%arg0: i32) -> (i32, i32) {
    %c0_i32 = arith.constant 0 : i32
    %c0_i32_0 = arith.constant 0 : i32
    %c0_i32_1 = arith.constant 0 : i32
    return %c0_i32, %c0_i32_0 : i32, i32
  }
  func.func @transform_4(%arg0: i32) -> (i32, i32) {
    %c0_i32 = arith.constant 0 : i32
    %c0_i32_0 = arith.constant 0 : i32
    return %arg0, %c0_i32 : i32, i32
  }
  func.func @transform_5(%arg0: i32) -> (i32, i32) {
    %c0_i32 = arith.constant 0 : i32
    %c0_i32_0 = arith.constant 0 : i32
    return %arg0, %c0_i32 : i32, i32
  }
  func.func @transform_6(%arg0: i32) -> (i32, i32) {
    %c0_i32 = arith.constant 0 : i32
    %c0_i32_0 = arith.constant 0 : i32
    return %arg0, %c0_i32 : i32, i32
  }
}

</mosaic_0001>

<bundles_post_ra>
// kernel: tpu_custom_call.1
= control target key start
LH: loop header
LB: loop body
LE: loop exit
PB: predicated region body
PF: predicated region fallthrough
CT: control target
= control target key end

     0   :  { %s1274_s21 = smov 0   ;;  %s1495_s0 = inlined_call_operand.vmem [shape: f32[256,32], index: 0, kind: input, shape index: {}]   ;;  %s1496_s1 = inlined_call_operand.vmem [shape: f32[32,16], index: 1, kind: input, shape index: {}]   ;;  %s1497_s2 = inlined_call_operand.vmem [shape: f32[16,1], index: 2, kind: input, shape index: {}]   ;;  %s1498_s3 = inlined_call_operand.vmem [shape: f32[16,1], index: 3, kind: input, shape index: {}]   ;;  %s1499_s4 = inlined_call_operand.vmem [shape: f32[256,16], index: 4, kind: output, shape index: {0}]   ;;  %s1500_s5 = inlined_call_operand.vmem [shape: f32[256,1], index: 5, kind: output, shape index: {1}]   ;;  %s1501_s6 = inlined_call_operand.vmem [shape: f32[256,1], index: 6, kind: output, shape index: {2}]  }
   0x1 LB: > { %s1012_s22 = sadd.s32 4294967295, %s1237_s21   ;;  %p1016_p0 = scmp.ge.s32.totalorder %s1237_s21, 1  ;;  %s1237_s21 = sphi %s1274_s21, %s17_s21  }
   0x2   : > { %p218_p1 = scmp.lt.s32.totalorder %s1237_s21, 3 }
   0x4   : > { %p219_p2 = pnand %p1016_p0, %p218_p1 }
   0x5   : > { %s1017_s27 = sshll.u32 (!%p219_p2), %s1012_s22, 4 }
   0x6   : > { %222 = sbr.rel (%p219_p2) target bundleno = 472 (0x1d8), region = 36  ;;  %p259_p3 = scmp.lt.s32.totalorder (!%p219_p2), %s1017_s27, 31 }
   0xb   : > { %v301_v0 = vld [vmem:[%s1496_s1 + $0x18] sm:$0xff]  ;;  %v300_v1 = vld [vmem:[%s1496_s1 + $0x10] sm:$0xff]  ;;  %v299_v2 = vld [vmem:[%s1496_s1 + $0x8] sm:$0xff]  ;;  %s1503_s27 = smov (!%p259_p3, %s1017_s27), 31  ;;  %vm302_vm0 = vcmask 261120   ;;  %vm496_vm1 = vcmask 130048  }
   0xc   : > { %1131 = vmatprep.subr.mxu0 %v301_v0  ;;  %v298_v3 = vld [vmem:[%s1496_s1] sm:$0xff]  ;;  %s1294_s8 = sshll.u32 %s1503_s27, 3  ;;  %v514_v20 = vld [vmem:[%s1497_s2 + $0x8] sm:$0xff]  ;;  %vm708_vm2 = vcmask 7168  }
   0xd   : > { %1132 = vmatpush3.msra.mxu0 %v301_v0  ;;  %s1300_s11 = scalar_lea.vmem %s1495_s0, %s1294_s8  ;;  %1219 = vmatprep.subr.mxu1 %v514_v20  ;;  %v513_v21 = vld [vmem:[%s1497_s2] sm:$0xff]  ;;  %v726_v22 = vld [vmem:[%s1498_s3 + $0x8] sm:$0xff]  ;;  %s1347_s20 = scalar_lea.vmem %s1499_s4, %s1294_s8 }
   0xe   : > { %1133 = vmatprep.subr.mxu0 %v300_v1  ;;  %v282_v4 = vld [vmem:[%s1300_s11] sm:$0xff]  ;;  %v283_v5 = vld [vmem:[%s1300_s11 + $0x8] sm:$0xff]  ;;  %v284_v6 = vld [vmem:[%s1300_s11 + $0x10] sm:$0xff]  ;;  %1221 = vmatpush3.msra.mxu1 %v514_v20  ;;  %s1420_s26 = scalar_lea.vmem %s1500_s5, %s1294_s8  ;;  %s1456_s29 = scalar_lea.vmem %s1501_s6, %s1294_s8 }
   0xf   : > { %1134 = vmatpush3.msra.mxu0 %v300_v1  ;;  %1139 = vmatprep.mubr.msk.f32.mxu0 %vm302_vm0, %v282_v4  ;;  %v285_v7 = vld [vmem:[%s1300_s11 + $0x18] sm:$0xff]  ;;  %v286_v8 = vld [vmem:[%s1300_s11 + $0x20] sm:$0xff]  ;;  %v287_v9 = vld [vmem:[%s1300_s11 + $0x28] sm:$0xff] }
  0x10   : > { %1135 = vmatprep.subr.mxu0 %v299_v2  ;;  %v288_v10 = vld [vmem:[%s1300_s11 + $0x30] sm:$0xff]  ;;  %v289_v11 = vld [vmem:[%s1300_s11 + $0x38] sm:$0xff]  ;;  %v290_v12 = vld [vmem:[%s1300_s11 + $0x40] sm:$0xff]  ;;  %1220 = vmatprep.subr.mxu1 %v513_v21 }
  0x11   : > { %1136 = vmatpush3.msra.mxu0 %v299_v2  ;;  %v291_v13 = vld [vmem:[%s1300_s11 + $0x48] sm:$0xff]  ;;  %v292_v14 = vld [vmem:[%s1300_s11 + $0x50] sm:$0xff]  ;;  %v293_v15 = vld [vmem:[%s1300_s11 + $0x58] sm:$0xff]  ;;  %1222 = vmatpush3.msra.mxu1 %v513_v21 }
  0x12   : > { %1137 = vmatprep.subr.mxu0 %v298_v3  ;;  %v294_v16 = vld [vmem:[%s1300_s11 + $0x60] sm:$0xff]  ;;  %v295_v17 = vld [vmem:[%s1300_s11 + $0x68] sm:$0xff]  ;;  %v296_v18 = vld [vmem:[%s1300_s11 + $0x70] sm:$0xff]  ;;  %1191 = vmatprep.subr.mxu1 %v726_v22 }
  0x13   : > { %1138 = vmatpush3.msra.mxu0 %v298_v3  ;;  %v297_v19 = vld [vmem:[%s1300_s11 + $0x78] sm:$0xff]  ;;  %v725_v31 = vld [vmem:[%s1498_s3] sm:$0xff] }
  0x14   : > { %1140 = vmatmul.mubr.msk.f32.vlgmr.msra.gmra.mxu0 %vm302_vm0, %v283_v5  ;;  %1163 = vmatprep.subr.mxu0 %v514_v20 }
  0x15   : > { %1142 = vmatprep.mubr.msk.f32.mxu0 %vm302_vm0, %v284_v6  ;;  %1164 = vmatpush3.msra.mxu0 %v514_v20 }
  0x16   : > { %1165 = vmatprep.subr.mxu0 %v513_v21 }
  0x17   : > { %1166 = vmatpush3.msra.mxu0 %v513_v21 }
  0x18   : > { %1143 = vmatmul.mubr.msk.f32.gmra.mxu0 %vm302_vm0, %v285_v7 }
  0x19   : > { %1145 = vmatprep.mubr.msk.f32.mxu0 %vm302_vm0, %v286_v8 }
  0x1c   : > { %1146 = vmatmul.mubr.msk.f32.gmra.mxu0 %vm302_vm0, %v287_v9 }
  0x1d   : > { %1148 = vmatprep.mubr.msk.f32.mxu0 %vm302_vm0, %v288_v10 }
  0x20   : > { %1149 = vmatmul.mubr.msk.f32.gmra.mxu0 %vm302_vm0, %v289_v11 }
  0x21   : > { %1151 = vmatprep.mubr.msk.f32.mxu0 %vm302_vm0, %v290_v12 }
  0x24   : > { %1152 = vmatmul.mubr.msk.f32.gmra.mxu0 %vm302_vm0, %v291_v13 }
  0x25   : > { %1154 = vmatprep.mubr.msk.f32.mxu0 %vm302_vm0, %v292_v14 }
  0x28   : > { %1155 = vmatmul.mubr.msk.f32.gmra.mxu0 %vm302_vm0, %v293_v15 }
  0x29   : > { %1157 = vmatprep.mubr.msk.f32.mxu0 %vm302_vm0, %v294_v16 }
  0x2c   : > { %1158 = vmatmul.mubr.msk.f32.gmra.mxu0 %vm302_vm0, %v295_v17 }
  0x2d   : > { %1160 = vmatprep.mubr.msk.f32.mxu0 %vm302_vm0, %v296_v18 }
  0x30   : > { %1161 = vmatmul.mubr.msk.f32.gmra.mxu0 %vm302_vm0, %v297_v19 }
  0xd4   : > { %v1141_v23 = vpop.f32.mrf.mxu0 }
  0xd5   : > { %498 = vst.msk [vmem:[%s1347_s20 + $0x8] sm:$0xff] %vm496_vm1, %v1141_v23 }
  0xd6   : > { %v417_v24 = vpop.f32.mrf.mxu0 }
  0xd7   : > { %497 = vst.msk [vmem:[%s1347_s20] sm:$0xff] %vm496_vm1, %v417_v24  ;;  %1167 = vmatprep.mubr.msk.f32.mxu0 %vm496_vm1, %v417_v24 }
  0xd8   : > { %v1144_v25 = vpop.f32.mrf.mxu0  ;;  %1168 = vmatmul.mubr.msk.f32.vlgmr.msra.gmra.mxu0 %vm496_vm1, %v1141_v23 }
  0xd9   : > { %500 = vst.msk [vmem:[%s1347_s20 + $0x18] sm:$0xff] %vm496_vm1, %v1144_v25 }
  0xda   : > { %v427_v26 = vpop.f32.mrf.mxu0 }
  0xdb   : > { %499 = vst.msk [vmem:[%s1347_s20 + $0x10] sm:$0xff] %vm496_vm1, %v427_v26  ;;  %1170 = vmatprep.mubr.msk.f32.mxu0 %vm496_vm1, %v427_v26 }
  0xdc   : > { %v1147_v27 = vpop.f32.mrf.mxu0  ;;  %1171 = vmatmul.mubr.msk.f32.gmra.mxu0 %vm496_vm1, %v1144_v25 }
  0xdd   : > { %502 = vst.msk [vmem:[%s1347_s20 + $0x28] sm:$0xff] %vm496_vm1, %v1147_v27 }
  0xde   : > { %v437_v28 = vpop.f32.mrf.mxu0 }
  0xdf   : > { %501 = vst.msk [vmem:[%s1347_s20 + $0x20] sm:$0xff] %vm496_vm1, %v437_v28  ;;  %1173 = vmatprep.mubr.msk.f32.mxu0 %vm496_vm1, %v437_v28 }
  0xe0   : > { %v1150_v29 = vpop.f32.mrf.mxu0  ;;  %1174 = vmatmul.mubr.msk.f32.gmra.mxu0 %vm496_vm1, %v1147_v27 }
  0xe1   : > { %504 = vst.msk [vmem:[%s1347_s20 + $0x38] sm:$0xff] %vm496_vm1, %v1150_v29 }
  0xe2   : > { %v447_v30 = vpop.f32.mrf.mxu0 }
  0xe3   : > { %503 = vst.msk [vmem:[%s1347_s20 + $0x30] sm:$0xff] %vm496_vm1, %v447_v30  ;;  %1176 = vmatprep.mubr.msk.f32.mxu1 %vm496_vm1, %v447_v30 }
  0xe4   : > { %v1153_v32 = vpop.f32.mrf.mxu0  ;;  %1177 = vmatmul.mubr.msk.f32.vlgmr.msra.gmra.mxu1 %vm496_vm1, %v1150_v29 }
  0xe5   : > { %506 = vst.msk [vmem:[%s1347_s20 + $0x48] sm:$0xff] %vm496_vm1, %v1153_v32  ;;  %1192 = vmatpush3.msra.mxu1 %v726_v22 }
  0xe6   : > { %v457_v33 = vpop.f32.mrf.mxu0  ;;  %1193 = vmatprep.subr.mxu1 %v725_v31 }
  0xe7   : > { %505 = vst.msk [vmem:[%s1347_s20 + $0x40] sm:$0xff] %vm496_vm1, %v457_v33  ;;  %1179 = vmatprep.mubr.msk.f32.mxu1 %vm496_vm1, %v457_v33  ;;  %1194 = vmatpush3.msra.mxu1 %v725_v31 }
  0xe8   : > { %v1156_v34 = vpop.f32.mrf.mxu0  ;;  %1180 = vmatmul.mubr.msk.f32.gmra.mxu1 %vm496_vm1, %v1153_v32 }
  0xe9   : > { %508 = vst.msk [vmem:[%s1347_s20 + $0x58] sm:$0xff] %vm496_vm1, %v1156_v34 }
  0xea   : > { %v467_v35 = vpop.f32.mrf.mxu0 }
  0xeb   : > { %507 = vst.msk [vmem:[%s1347_s20 + $0x50] sm:$0xff] %vm496_vm1, %v467_v35  ;;  %1182 = vmatprep.mubr.msk.f32.mxu1 %vm496_vm1, %v467_v35 }
  0xec   : > { %v1159_v36 = vpop.f32.mrf.mxu0  ;;  %1183 = vmatmul.mubr.msk.f32.gmra.mxu1 %vm496_vm1, %v1156_v34 }
  0xed   : > { %510 = vst.msk [vmem:[%s1347_s20 + $0x68] sm:$0xff] %vm496_vm1, %v1159_v36 }
  0xee   : > { %v477_v37 = vpop.f32.mrf.mxu0 }
  0xef   : > { %509 = vst.msk [vmem:[%s1347_s20 + $0x60] sm:$0xff] %vm496_vm1, %v477_v37  ;;  %1185 = vmatprep.mubr.msk.f32.mxu1 %vm496_vm1, %v477_v37 }
  0xf0   : > { %v1162_v38 = vpop.f32.mrf.mxu0  ;;  %1186 = vmatmul.mubr.msk.f32.gmra.mxu1 %vm496_vm1, %v1159_v36 }
  0xf1   : > { %512 = vst.msk [vmem:[%s1347_s20 + $0x78] sm:$0xff] %vm496_vm1, %v1162_v38 }
  0xf2   : > { %v487_v39 = vpop.f32.mrf.mxu0 }
  0xf3   : > { %511 = vst.msk [vmem:[%s1347_s20 + $0x70] sm:$0xff] %vm496_vm1, %v487_v39  ;;  %1188 = vmatprep.mubr.msk.f32.mxu1 %vm496_vm1, %v487_v39 }
  0xf4   : > { %1189 = vmatmul.mubr.msk.f32.gmra.mxu1 %vm496_vm1, %v1162_v38 }
  0xf5   : > { %1195 = vmatprep.mubr.msk.f32.mxu1 %vm496_vm1, %v417_v24 }
  0xf8   : > { %1196 = vmatmul.mubr.msk.f32.vlgmr.msra.gmra.mxu1 %vm496_vm1, %v1141_v23 }
  0xf9   : > { %1198 = vmatprep.mubr.msk.f32.mxu1 %vm496_vm1, %v427_v26 }
  0xfc   : > { %1199 = vmatmul.mubr.msk.f32.gmra.mxu1 %vm496_vm1, %v1144_v25 }
  0xfd   : > { %1201 = vmatprep.mubr.msk.f32.mxu1 %vm496_vm1, %v437_v28 }
 0x100   : > { %1202 = vmatmul.mubr.msk.f32.gmra.mxu1 %vm496_vm1, %v1147_v27 }
 0x101   : > { %1204 = vmatprep.mubr.msk.f32.mxu1 %vm496_vm1, %v447_v30 }
 0x104   : > { %1205 = vmatmul.mubr.msk.f32.gmra.mxu1 %vm496_vm1, %v1150_v29 }
 0x105   : > { %1207 = vmatprep.mubr.msk.f32.mxu1 %vm496_vm1, %v457_v33 }
 0x108   : > { %1208 = vmatmul.mubr.msk.f32.gmra.mxu1 %vm496_vm1, %v1153_v32 }
 0x109   : > { %1210 = vmatprep.mubr.msk.f32.mxu1 %vm496_vm1, %v467_v35 }
 0x10c   : > { %1211 = vmatmul.mubr.msk.f32.gmra.mxu1 %vm496_vm1, %v1156_v34 }
 0x10d   : > { %1213 = vmatprep.mubr.msk.f32.mxu1 %vm496_vm1, %v477_v37 }
 0x110   : > { %1214 = vmatmul.mubr.msk.f32.gmra.mxu1 %vm496_vm1, %v1159_v36 }
 0x111   : > { %1216 = vmatprep.mubr.msk.f32.mxu1 %vm496_vm1, %v487_v39 }
 0x114   : > { %1217 = vmatmul.mubr.msk.f32.gmra.mxu1 %vm496_vm1, %v1162_v38 }
 0x198   : > { %v1169_v40 = vpop.f32.mrf.mxu0 }
 0x199   : > { %710 = vst.msk [vmem:[%s1420_s26 + $0x8] sm:$0xff] %vm708_vm2, %v1169_v40 }
 0x19a   : > { %v629_v41 = vpop.f32.mrf.mxu0 }
 0x19b   : > { %709 = vst.msk [vmem:[%s1420_s26] sm:$0xff] %vm708_vm2, %v629_v41 }
 0x19c   : > { %v1172_v42 = vpop.f32.mrf.mxu0 }
 0x19d   : > { %712 = vst.msk [vmem:[%s1420_s26 + $0x18] sm:$0xff] %vm708_vm2, %v1172_v42 }
 0x19e   : > { %v639_v43 = vpop.f32.mrf.mxu0 }
 0x19f   : > { %711 = vst.msk [vmem:[%s1420_s26 + $0x10] sm:$0xff] %vm708_vm2, %v639_v43 }
 0x1a0   : > { %v1175_v44 = vpop.f32.mrf.mxu0 }
 0x1a1   : > { %714 = vst.msk [vmem:[%s1420_s26 + $0x28] sm:$0xff] %vm708_vm2, %v1175_v44 }
 0x1a2   : > { %v649_v45 = vpop.f32.mrf.mxu0 }
 0x1a3   : > { %713 = vst.msk [vmem:[%s1420_s26 + $0x20] sm:$0xff] %vm708_vm2, %v649_v45 }
 0x1a4   : > { %v1178_v46 = vpop.f32.mrf.mxu1 }
 0x1a5   : > { %716 = vst.msk [vmem:[%s1420_s26 + $0x38] sm:$0xff] %vm708_vm2, %v1178_v46 }
 0x1a6   : > { %v659_v47 = vpop.f32.mrf.mxu1 }
 0x1a7   : > { %715 = vst.msk [vmem:[%s1420_s26 + $0x30] sm:$0xff] %vm708_vm2, %v659_v47 }
 0x1a8   : > { %v1181_v48 = vpop.f32.mrf.mxu1 }
 0x1a9   : > { %718 = vst.msk [vmem:[%s1420_s26 + $0x48] sm:$0xff] %vm708_vm2, %v1181_v48 }
 0x1aa   : > { %v669_v49 = vpop.f32.mrf.mxu1 }
 0x1ab   : > { %717 = vst.msk [vmem:[%s1420_s26 + $0x40] sm:$0xff] %vm708_vm2, %v669_v49 }
 0x1ac   : > { %v1184_v50 = vpop.f32.mrf.mxu1 }
 0x1ad   : > { %720 = vst.msk [vmem:[%s1420_s26 + $0x58] sm:$0xff] %vm708_vm2, %v1184_v50 }
 0x1ae   : > { %v679_v51 = vpop.f32.mrf.mxu1 }
 0x1af   : > { %719 = vst.msk [vmem:[%s1420_s26 + $0x50] sm:$0xff] %vm708_vm2, %v679_v51 }
 0x1b0   : > { %v1187_v52 = vpop.f32.mrf.mxu1 }
 0x1b1   : > { %722 = vst.msk [vmem:[%s1420_s26 + $0x68] sm:$0xff] %vm708_vm2, %v1187_v52 }
 0x1b2   : > { %v689_v53 = vpop.f32.mrf.mxu1 }
 0x1b3   : > { %721 = vst.msk [vmem:[%s1420_s26 + $0x60] sm:$0xff] %vm708_vm2, %v689_v53 }
 0x1b4   : > { %v1190_v54 = vpop.f32.mrf.mxu1 }
 0x1b5   : > { %724 = vst.msk [vmem:[%s1420_s26 + $0x78] sm:$0xff] %vm708_vm2, %v1190_v54 }
 0x1b6   : > { %v699_v55 = vpop.f32.mrf.mxu1 }
 0x1b7   : > { %723 = vst.msk [vmem:[%s1420_s26 + $0x70] sm:$0xff] %vm708_vm2, %v699_v55 }
 0x1b8   : > { %v1197_v56 = vpop.f32.mrf.mxu1 }
 0x1b9   : > { %873 = vst.msk [vmem:[%s1456_s29 + $0x8] sm:$0xff] %vm708_vm2, %v1197_v56 }
 0x1ba   : > { %v793_v57 = vpop.f32.mrf.mxu1 }
 0x1bb   : > { %872 = vst.msk [vmem:[%s1456_s29] sm:$0xff] %vm708_vm2, %v793_v57 }
 0x1bc   : > { %v1200_v58 = vpop.f32.mrf.mxu1 }
 0x1bd   : > { %875 = vst.msk [vmem:[%s1456_s29 + $0x18] sm:$0xff] %vm708_vm2, %v1200_v58 }
 0x1be   : > { %v803_v59 = vpop.f32.mrf.mxu1 }
 0x1bf   : > { %874 = vst.msk [vmem:[%s1456_s29 + $0x10] sm:$0xff] %vm708_vm2, %v803_v59 }
 0x1c0   : > { %v1203_v60 = vpop.f32.mrf.mxu1 }
 0x1c1   : > { %877 = vst.msk [vmem:[%s1456_s29 + $0x28] sm:$0xff] %vm708_vm2, %v1203_v60 }
 0x1c2   : > { %v813_v61 = vpop.f32.mrf.mxu1 }
 0x1c3   : > { %876 = vst.msk [vmem:[%s1456_s29 + $0x20] sm:$0xff] %vm708_vm2, %v813_v61 }
 0x1c4   : > { %v1206_v62 = vpop.f32.mrf.mxu1 }
 0x1c5   : > { %879 = vst.msk [vmem:[%s1456_s29 + $0x38] sm:$0xff] %vm708_vm2, %v1206_v62 }
 0x1c6   : > { %v823_v63 = vpop.f32.mrf.mxu1 }
 0x1c7   : > { %878 = vst.msk [vmem:[%s1456_s29 + $0x30] sm:$0xff] %vm708_vm2, %v823_v63 }
 0x1c8   : > { %v1209_v0 = vpop.f32.mrf.mxu1 }
 0x1c9   : > { %881 = vst.msk [vmem:[%s1456_s29 + $0x48] sm:$0xff] %vm708_vm2, %v1209_v0 }
 0x1ca   : > { %v833_v1 = vpop.f32.mrf.mxu1 }
 0x1cb   : > { %880 = vst.msk [vmem:[%s1456_s29 + $0x40] sm:$0xff] %vm708_vm2, %v833_v1 }
 0x1cc   : > { %v1212_v2 = vpop.f32.mrf.mxu1 }
 0x1cd   : > { %883 = vst.msk [vmem:[%s1456_s29 + $0x58] sm:$0xff] %vm708_vm2, %v1212_v2 }
 0x1ce   : > { %v843_v3 = vpop.f32.mrf.mxu1 }
 0x1cf   : > { %882 = vst.msk [vmem:[%s1456_s29 + $0x50] sm:$0xff] %vm708_vm2, %v843_v3 }
 0x1d0   : > { %v1215_v4 = vpop.f32.mrf.mxu1 }
 0x1d1   : > { %885 = vst.msk [vmem:[%s1456_s29 + $0x68] sm:$0xff] %vm708_vm2, %v1215_v4 }
 0x1d2   : > { %v853_v5 = vpop.f32.mrf.mxu1 }
 0x1d3   : > { %884 = vst.msk [vmem:[%s1456_s29 + $0x60] sm:$0xff] %vm708_vm2, %v853_v5 }
 0x1d4   : > { %v1218_v6 = vpop.f32.mrf.mxu1 }
 0x1d5   : > { %887 = vst.msk [vmem:[%s1456_s29 + $0x78] sm:$0xff] %vm708_vm2, %v1218_v6 }
 0x1d6   : > { %v863_v7 = vpop.f32.mrf.mxu1 }
 0x1d7   : > { %886 = vst.msk [vmem:[%s1456_s29 + $0x70] sm:$0xff] %vm708_vm2, %v863_v7 }
 0x1d8 PF: > { %s17_s21 = sadd.s32 1, %s1237_s21  }
 0x1d9   : > { %p14_p4 = scmp.ge.s32.totalorder %s17_s21, 4  }
 0x1db   :  { %16 = sbr.rel (!%p14_p4) target bundleno = 1 (0x1), region = 90 }

</bundles_post_ra>
